<compile_context>
chip_gen: v7x
topology: tpu7x:2x2x1
jax: 0.10.0
libtpu: 0.0.40
codegen_flags: <defaults>
</compile_context>

<pallas_src>
import jax
import jax.numpy as jnp
from jax.experimental import pallas as pl
from jax.experimental.pallas import tpu as pltpu

HIDDEN = 512    # encoder output dim / classifier fan-in (fixed by the module)
LANES = 128     # TPU lane width
SUBLANES = 8    # TPU sublane width

# The mean-before-project / W_enc@W_cls fusion is ONLY valid because the
# stand-in encoder is a linear per-token map.  Flip to False when the real
# (non-linear) pre-trained encoder lands so this wrapper fails loudly instead
# of silently computing the wrong thing.
ENCODER_IS_LINEAR = True


def finetune_kernel(x_ref, w_ref, b_ref, out_ref):
    """One batch tile of the fused forward pass (fully VMEM-resident).

    x_ref   : (tb, T*D)    f32   flattened tokens for this batch tile
    w_ref   : (T*D, C_pad) bf16  fused (mean o encoder o classifier) weight
    b_ref   : (1,  C_pad)  f32   fused bias
    out_ref : (tb, C_pad)  f32   logits (lane-padded)
    """
    logits = jnp.dot(x_ref[...].astype(jnp.bfloat16), w_ref[...],
                     preferred_element_type=jnp.float32)    # MXU, f32 accumulate
    out_ref[...] = logits + b_ref[...]                      # f32 VPU add, lane-dense store


def _round_up(n, m):
    return ((n + m - 1) // m) * m


def finetune_forward(x, w_enc, b_enc, w_cls, b_cls, *, block_b=1024):
    """FinetuneModel.forward.  x: (B, T, D_in) f32 -> logits (B, C) f32."""
    assert ENCODER_IS_LINEAR, (
        "mean/encoder/classifier fusion requires the linear stand-in encoder")
    B, T, D = x.shape
    H, C = w_cls.shape
    assert H == HIDDEN and w_enc.shape == (D, HIDDEN)
    K = T * D

    # ---- one-time weight prep (products in f32; single bf16 cast at the end) ----
    c_pad = pl.cdiv(C, LANES) * LANES
    w_cls_p = jnp.pad(w_cls, ((0, 0), (0, c_pad - C)))                  # (512, C_pad) f32
    b_cls_p = jnp.pad(b_cls.reshape(1, C), ((0, 0), (0, c_pad - C)))    # (1,   C_pad) f32
    # mean over T folded into the encoder weight, then encoder folded into the head.
    w_fold = jnp.tile(w_enc, (T, 1)) / jnp.float32(T)                   # (T*D, 512)   f32
    w_comb = (w_fold @ w_cls_p).astype(jnp.bfloat16)                    # (T*D, C_pad) bf16
    b_comb = b_enc.reshape(1, HIDDEN) @ w_cls_p + b_cls_p               # (1,   C_pad) f32

    # Lane-dense view of x: contiguous (B, T, D) -> (B, T*D) reshape is free in HBM.
    # NOTE: no wrapper-side bf16 cast of x (would add an extra HBM pass);
    # accept bf16 x from an upstream producer if available.
    x2 = x.reshape(B, K)

    # ---- batch tiling ----
    tb = min(block_b, B)
    if tb < B:
        tb = max(SUBLANES, (tb // SUBLANES) * SUBLANES)   # partial tiles need 8-row alignment
    elif B >= 2 * SUBLANES:
        # >= 2 grid steps so the "parallel" batch axis can split across v7x's 2 TCs.
        tb = _round_up(pl.cdiv(B, 2), SUBLANES)
    grid = (pl.cdiv(B, tb),)

    # ---- explicit VMEM budget: double-buffered x/out + resident fused weights ----
    x_blk = tb * K * 4
    out_blk = tb * c_pad * 4
    w_bytes = K * c_pad * 2 + SUBLANES * c_pad * 4
    vmem_limit = int(min(64 << 20,
                         max(2 * (x_blk + out_blk) + w_bytes + (2 << 20), 16 << 20)))

    cost = pl.CostEstimate(
        flops=2 * B * K * c_pad,
        transcendentals=0,
        bytes_accessed=B * K * 4 + K * c_pad * 2 + c_pad * 4 + B * c_pad * 4,
    )

    out_padded = pl.pallas_call(
        finetune_kernel,
        out_shape=jax.ShapeDtypeStruct((B, c_pad), jnp.float32),
        grid=grid,
        in_specs=[
            pl.BlockSpec((tb, K), lambda i: (i, 0)),       # x batch tile (streamed, lane-dense)
            pl.BlockSpec((K, c_pad), lambda i: (0, 0)),    # fused weight (VMEM-resident)
            pl.BlockSpec((1, c_pad), lambda i: (0, 0)),    # fused bias   (VMEM-resident)
        ],
        out_specs=pl.BlockSpec((tb, c_pad), lambda i: (i, 0)),
        compiler_params=pltpu.CompilerParams(
            dimension_semantics=("parallel",),             # batch tiles independent
            vmem_limit_bytes=vmem_limit,
        ),
        cost_estimate=cost,
    )(x2, w_comb, b_comb)

    return out_padded[:, :C]


def _linear_init(key, fan_in, fan_out):
    """PyTorch nn.Linear default init: U(-1/sqrt(fan_in), 1/sqrt(fan_in))."""
    kw, kb = jax.random.split(key)
    bound = 1.0 / jnp.sqrt(jnp.float32(fan_in))
    w = jax.random.uniform(kw, (fan_in, fan_out), jnp.float32, -bound, bound)
    b = jax.random.uniform(kb, (1, fan_out), jnp.float32, -bound, bound)
    return w, b


if __name__ == "__main__":
    B, T, D_IN, NUM_CLASSES = 2, 8, 32, 10

    key = jax.random.PRNGKey(0)
    k_x, k_enc, k_cls = jax.random.split(key, 3)

    x = jax.random.normal(k_x, (B, T, D_IN), jnp.float32)
    w_enc, b_enc = _linear_init(k_enc, D_IN, HIDDEN)          # stand-in encoder
    w_cls, b_cls = _linear_init(k_cls, HIDDEN, NUM_CLASSES)   # classifier head

    logits = finetune_forward(x, w_enc, b_enc, w_cls, b_cls)
    logits = jax.block_until_ready(logits)

    # Pure-JAX f32 reference of the ORIGINAL op order (project every token,
    # add bias, mean over T, classify).  Kernel uses bf16 MXU operands, so
    # tolerances are loosened accordingly.
    feats_ref = jnp.einsum("btd,dh->bth", x, w_enc) + b_enc[0]
    pooled_ref = jnp.mean(feats_ref, axis=1)
    logits_ref = pooled_ref @ w_cls + b_cls[0]

    assert logits.shape == (B, NUM_CLASSES)
    assert jnp.allclose(logits, logits_ref, atol=1e-2, rtol=1e-2), (
        float(jnp.max(jnp.abs(logits - logits_ref))))

    print("KERNEL_OK")
</pallas_src>

<mosaic_0001>
module attributes {stable_mosaic.version = 11 : i64} {
  func.func @finetune_kernel(%arg0: i32, %arg1: memref<2x256xf32, #tpu.memory_space<vmem>>, %arg2: memref<256x128xbf16, #tpu.memory_space<vmem>>, %arg3: memref<1x128xf32, #tpu.memory_space<vmem>>, %arg4: memref<2x128xf32, #tpu.memory_space<vmem>>) attributes {dimension_semantics = [#tpu.dimension_semantics<parallel>], iteration_bounds = array<i64: 1>, scalar_prefetch = 0 : i64, scratch_operands = 0 : i64, tpu.core_type = #tpu.core_type<tc>, window_params = [{transform_indices = @transform_0, window_bounds = array<i64: 2, 256>}, {pipeline_mode = #tpu.pipeline_mode<synchronous>, transform_indices = @transform_1, window_bounds = array<i64: 256, 128>}, {pipeline_mode = #tpu.pipeline_mode<synchronous>, transform_indices = @transform_2, window_bounds = array<i64: 1, 128>}, {transform_indices = @transform_3, window_bounds = array<i64: 2, 128>}]} {
    %c0 = arith.constant 0 : index
    %c0_0 = arith.constant 0 : index
    %0 = vector.load %arg1[%c0, %c0_0] : memref<2x256xf32, #tpu.memory_space<vmem>>, vector<2x256xf32>
    %1 = arith.truncf %0 : vector<2x256xf32> to vector<2x256xbf16>
    %c0_1 = arith.constant 0 : index
    %c0_2 = arith.constant 0 : index
    %2 = vector.load %arg2[%c0_1, %c0_2] : memref<256x128xbf16, #tpu.memory_space<vmem>>, vector<256x128xbf16>
    %cst = arith.constant dense<0.000000e+00> : vector<2x128xf32>
    %3 = tpu.matmul %1, %2, %cst {dimension_numbers = #tpu.dot_dimension_numbers<[1], [0], [0], [1], [0, 0, 1, 1], [], []>} : vector<2x256xbf16>, vector<256x128xbf16>, vector<2x128xf32> -> vector<2x128xf32>
    %c0_3 = arith.constant 0 : index
    %c0_4 = arith.constant 0 : index
    %4 = vector.load %arg3[%c0_3, %c0_4] : memref<1x128xf32, #tpu.memory_space<vmem>>, vector<1x128xf32>
    %5 = vector.broadcast %4 : vector<1x128xf32> to vector<2x128xf32>
    %6 = arith.addf %3, %5 : vector<2x128xf32>
    %c0_5 = arith.constant 0 : index
    %c0_6 = arith.constant 0 : index
    %7 = vector.load %arg4[%c0_5, %c0_6] : memref<2x128xf32, #tpu.memory_space<vmem>>, vector<2x128xf32>
    tpu.vector_store %arg4[%c0_5, %c0_6], %6 {strides = array<i32>} : memref<2x128xf32, #tpu.memory_space<vmem>>, vector<2x128xf32>,
    return
  }
  func.func @transform_0(%arg0: i32) -> (i32, i32) {
    %c0_i32 = arith.constant 0 : i32
    %c0_i32_0 = arith.constant 0 : i32
    return %arg0, %c0_i32 : i32, i32
  }
  func.func @transform_1(%arg0: i32) -> (i32, i32) {
    %c0_i32 = arith.constant 0 : i32
    %c0_i32_0 = arith.constant 0 : i32
    %c0_i32_1 = arith.constant 0 : i32
    return %c0_i32, %c0_i32_0 : i32, i32
  }
  func.func @transform_2(%arg0: i32) -> (i32, i32) {
    %c0_i32 = arith.constant 0 : i32
    %c0_i32_0 = arith.constant 0 : i32
    %c0_i32_1 = arith.constant 0 : i32
    return %c0_i32, %c0_i32_0 : i32, i32
  }
  func.func @transform_3(%arg0: i32) -> (i32, i32) {
    %c0_i32 = arith.constant 0 : i32
    %c0_i32_0 = arith.constant 0 : i32
    return %arg0, %c0_i32 : i32, i32
  }
}

</mosaic_0001>

<bundles_post_ra>
// kernel: tpu_custom_call.1
= control target key start
LH: loop header
LB: loop body
LE: loop exit
PB: predicated region body
PF: predicated region fallthrough
CT: control target
= control target key end

     0   :  { %8 = vsyncpa [#allocation3], 0  ;;  %s452_s0 = inlined_call_operand.hbm [shape: f32[2,256], index: 0, kind: input, shape index: {}]   ;;  %s453_s1 = inlined_call_operand.hbm [shape: bf16[256,128], index: 1, kind: input, shape index: {}]   ;;  %s454_s2 = inlined_call_operand.vmem [shape: f32[1,128], index: 2, kind: input, shape index: {}]   ;;  %s455_s3 = inlined_call_operand.hbm [shape: f32[2,128], index: 3, kind: output, shape index: {}]  }
   0x1   :  { %9 = vsyncpa [#allocation6], 0 }
   0x2   :  { %10 = vsyncpa [#allocation4], 0  ;;  %s381_s12 = smov [#allocation2]   ;;  %s382_s14 = smov [#allocation5]  }
   0x3   :  { %s17_s13 = sshll.u32 %s381_s12, 4  ;;  %s26_s15 = sshll.u32 %s382_s14, 4  ;;  %s18_s13 = int_to_ptr.vmem [resolvable:$true] %s17_s13  ;;  %s406_s15 = int_to_ptr.vmem [resolvable:$true] %s26_s15 }
   0x4   :  { %s309_s18 = scalar_lea.hbm %s452_s0, 64 }
   0x5   :  { %p310_p0 = scmp.ne.s32.totalorder %s452_s0, %s309_s18  ;;  %p313_p1 = scmp.lt.u32.totalorder %s309_s18, %s452_s0 }
   0x7   :  { %p315_p2 = pnand %p313_p1, %p310_p0 }
   0x9   :  { %318 = shalt.err (!%p315_p2)
}
   0xa   :  { %s319_s23 = scalar_lea.vmem %s18_s13, 64  ;;  %p324_p4 = scmp.lt.s32.totalorder %s18_s13, %s18_s13 }
   0xb   :  { %p320_p3 = scmp.ne.s32.totalorder %s18_s13, %s319_s23  ;;  %p325_p5 = scmp.lt.s32.totalorder %s319_s23, %s319_s23 }
   0xd   :  { %p326_p6 = por %p325_p5, %p324_p4 }
   0xf   :  { %p327_p7 = pnand %p326_p6, %p320_p3 }
  0x11   :  { %330 = shalt.err (!%p327_p7)
}
  0x12   :  { %20 = dma.hbm_to_vmem [thread:$0]  %s452_s0, 64, %s18_s13, [#allocation3]  }
  0x13   :  { %s331_s28 = scalar_lea.hbm %s453_s1, 2048 }
  0x14   :  { %p332_p8 = scmp.ne.s32.totalorder %s453_s1, %s331_s28  ;;  %p335_p9 = scmp.lt.u32.totalorder %s331_s28, %s453_s1 }
  0x16   :  { %p337_p10 = pnand %p335_p9, %p332_p8 }
  0x18   :  { %340 = shalt.err (!%p337_p10)
}
  0x19   :  { %s341_s6 = scalar_lea.vmem %s406_s15, 2048  ;;  %p346_p12 = scmp.lt.s32.totalorder %s406_s15, %s406_s15 }
  0x1a   :  { %p342_p11 = scmp.ne.s32.totalorder %s406_s15, %s341_s6  ;;  %p347_p13 = scmp.lt.s32.totalorder %s341_s6, %s341_s6 }
  0x1c   :  { %p348_p0 = por %p347_p13, %p346_p12 }
  0x1e   :  { %p349_p1 = pnand %p348_p0, %p342_p11 }
  0x20   :  { %352 = shalt.err (!%p349_p1)
}
  0x21   :  { %s383_s0 = smov 64   ;;  %s384_s7 = smov 4  }
  0x22   :  { %32 = dma.hbm_to_vmem [thread:$0]  %s453_s1, 2048, %s406_s15, [#allocation6], %s383_s0, %s383_s0, %s384_s7  }
  0x23   :  { %375 = dma.done.wait [#allocation3], 64  }
  0x24   :  { %376 = vsyncadd [#allocation3], 4294967232 }
  0x25   :  { %377 = dma.done.wait [#allocation6], 2048  }
  0x26   :  { %378 = vsyncadd [#allocation6], 4294965248  ;;  %v293_v0 = vld [vmem:[#allocation5 + $0x40] sm:$0xff]   ;;  %v295_v2 = vld [vmem:[#allocation5 + $0x48] sm:$0xff]   ;;  %s385_s11 = smov [#allocation7]  }
  0x27   :  { %v294_v1 = vld [vmem:[#allocation5] sm:$0xff]   ;;  %266 = vmatprep.subr.bf16.mxu0 %v293_v0  ;;  %v296_v3 = vld [vmem:[#allocation5 + $0x8] sm:$0xff]   ;;  %v297_v4 = vld [vmem:[#allocation5 + $0x50] sm:$0xff]   ;;  %s238_s12 = sshll.u32 %s385_s11, 4  ;;  %s239_s12 = int_to_ptr.vmem [resolvable:$true] %s238_s12 }
  0x28   :  { %267 = vmatpush3.bf16.msra.mxu0 %v294_v1  ;;  %v298_v5 = vld [vmem:[#allocation5 + $0x10] sm:$0xff]   ;;  %v299_v6 = vld [vmem:[#allocation5 + $0x58] sm:$0xff]   ;;  %v301_v8 = vld [vmem:[#allocation5 + $0x60] sm:$0xff]   ;;  %s353_s13 = scalar_lea.vmem %s239_s12, 32  ;;  %p358_p3 = scmp.lt.s32.totalorder %s239_s12, %s239_s12 }
  0x29   :  { %268 = vmatprep.subr.bf16.mxu0 %v295_v2  ;;  %v300_v7 = vld [vmem:[#allocation5 + $0x18] sm:$0xff]   ;;  %v302_v9 = vld [vmem:[#allocation5 + $0x20] sm:$0xff]   ;;  %v303_v10 = vld [vmem:[#allocation5 + $0x68] sm:$0xff]   ;;  %p354_p2 = scmp.ne.s32.totalorder %s239_s12, %s353_s13  ;;  %p359_p4 = scmp.lt.s32.totalorder %s353_s13, %s353_s13 }
  0x2a   :  { %v248_v11 = vld.sshfl [vmem:[#allocation2] sm:$0x33 pattern:$0x76325410]  ;;  %v304_v13 = vld [vmem:[#allocation5 + $0x28] sm:$0xff]   ;;  %v305_v15 = vld [vmem:[#allocation5 + $0x70] sm:$0xff]  }
  0x2b   :  { %v51_v12 = vcombine.high %v248_v11, %v248_v11  ;;  %v306_v16 = vld [vmem:[#allocation5 + $0x30] sm:$0xff]   ;;  %v307_v17 = vld [vmem:[#allocation5 + $0x78] sm:$0xff]   ;;  %v54_v19 = vpack.c.bf16 %v248_v11, %v248_v11  ;;  %p360_p5 = por %p359_p4, %p358_p3 }
  0x2c   :  { %269 = vmatpush3.bf16.msra.mxu0 %v296_v3  ;;  %v308_v18 = vld [vmem:[#allocation5 + $0x38] sm:$0xff]  }
  0x2d   :  { %270 = vmatprep.subr.bf16.mxu0 %v297_v4  ;;  %v55_v14 = vpack.c.bf16 %v51_v12, %v51_v12  ;;  %v249_v21 = vld [vmem:[%s454_s2] ss:$0 sm:$0xff]  ;;  %p361_p6 = pnand %p360_p5, %p354_p2 }
  0x2f   :  { %223 = vmatprep.mubr.bf16.mxu0 %v55_v14 }
  0x30   :  { %271 = vmatpush3.bf16.msra.mxu0 %v298_v5 }
  0x31   :  { %272 = vmatprep.subr.bf16.mxu0 %v299_v6 }
  0x34   :  { %273 = vmatpush3.bf16.msra.mxu0 %v300_v7 }
  0x35   :  { %274 = vmatprep.subr.bf16.mxu0 %v301_v8 }
  0x38   :  { %275 = vmatpush3.bf16.msra.mxu0 %v302_v9 }
  0x39   :  { %276 = vmatprep.subr.bf16.mxu0 %v303_v10 }
  0x3c   :  { %277 = vmatpush3.bf16.msra.mxu0 %v304_v13 }
  0x3d   :  { %278 = vmatprep.subr.bf16.mxu0 %v305_v15 }
  0x40   :  { %279 = vmatpush3.bf16.msra.mxu0 %v306_v16 }
  0x41   :  { %280 = vmatprep.subr.bf16.mxu0 %v307_v17 }
  0x44   :  { %281 = vmatpush3.bf16.msra.mxu0 %v308_v18 }
  0x47   :  { %224 = vmatmul.mubr.bf16.vlgmr.msra.gmra.mrb[0].mxu0 %v54_v19 }
 0x11a   :  { %v282_v20 = vpop.f32.mrb[0].mxu0 }
 0x11b   :  { %v283_v22 = vpop.f32.mrb[1].mxu0 }
 0x11c   :  { %v284_v23 = vadd.f32 %v283_v22, %v282_v20  ;;  %v285_v24 = vpop.f32.mrb[2].mxu0 }
 0x11d   :  { %v286_v25 = vpop.f32.mrb[3].mxu0 }
 0x11e   :  { %v226_v26 = vadd.f32 %v284_v23, %v249_v21 }
 0x120   :  { %231 = vst [vmem:[#allocation7] sm:$0x3] %v226_v26 }
 0x121   :  { %364 = shalt.err (!%p361_p6)
}
 0x122   :  { %s365_s2 = scalar_lea.hbm %s455_s3, 32 }
 0x123   :  { %p366_p7 = scmp.ne.s32.totalorder %s455_s3, %s365_s2  ;;  %p369_p8 = scmp.lt.u32.totalorder %s365_s2, %s455_s3 }
 0x125   :  { %p371_p9 = pnand %p369_p8, %p366_p7 }
 0x127   :  { %374 = shalt.err (!%p371_p9)
}
 0x128   :  { %241 = dma.vmem_to_hbm [thread:$0]  %s239_s12, 32, %s455_s3, [#allocation4]  }
 0x129   :  { %379 = dma.done.wait [#allocation4], 32  }
 0x12a   :  { %380 = vsyncadd [#allocation4], 4294967264 }
 0x12b   :  { %245 = vsyncpa [#allocation3], 1 }
 0x12c   :  { %246 = vsyncpa [#allocation6], 1 }
 0x12d   :  { %247 = vsyncpa [#allocation4], 1 }

</bundles_post_ra>
